<compile_context>
chip_gen: v7x
topology: tpu7x:2x2x1
jax: 0.10.0
libtpu: 0.0.40
codegen_flags: <defaults>
</compile_context>

<pallas_src>
import math

import jax
import jax.numpy as jnp
from jax import lax
from jax.experimental import pallas as pl
from jax.experimental.pallas import tpu as pltpu

C = 3          # xyz channels == MHA embed_dim
LANES = 128    # vreg lane width

# Offsets into the packed SMEM parameter vector.  The full module parameters are
# packed for parity with the PyTorch module even though the fused kernel only
# needs Wv/bv, Wo/bo, the Conv1d(3->1) weight and the Conv1d(1->1) weight/bias.
_WQ, _WK, _WV, _WO = 0, 9, 18, 27      # 3x3 blocks, flattened as [c_in * 3 + c_out]
_BQ, _BK, _BV, _BO = 36, 39, 42, 45    # length-3 biases
_W1, _C2W, _C2B = 48, 51, 52           # Conv1d(3->1) weight (3), Conv1d(1->1) w, b
_NUM_SCALARS = 53

# TODO(synk): get_knn_index is not defined in the reference module; it is provably
# irrelevant here (sum over k of softmax over k == 1), so no k-NN / gather kernel
# is emitted and the graph-feature stage is constant-folded instead.


def _fused_kernel(p_ref, ln_ref, o_ref):
    """p_ref: SMEM (53,) packed scalars.
    ln_ref: VMEM (2, R, 128) LayerNorm gamma (row 0) / beta (row 1), lane-dense.
    o_ref : VMEM (B, R, 128) output (all B rows written by this single program).
    """
    f32 = jnp.float32

    # ---- stage 1: graph feature.  sum_k softmax_k(.) == 1  =>  x_f == ones(B, N, 3).
    # ---- stage 2: single-head MHA with identical key/value rows.  The softmax over
    #      the key axis is exactly uniform, so attn == v0 (a constant 3-vector);
    #      the q/k projections and the score softmax are algebraically dead and
    #      have been removed (perf review).  Everything here is scalar SMEM math.
    v0 = [p_ref[_WV + 0 * 3 + c] + p_ref[_WV + 1 * 3 + c]
          + p_ref[_WV + 2 * 3 + c] + p_ref[_BV + c] for c in range(C)]
    uf = [v0[0] * p_ref[_WO + 0 * 3 + c] + v0[1] * p_ref[_WO + 1 * 3 + c]
          + v0[2] * p_ref[_WO + 2 * 3 + c] + p_ref[_BO + c] for c in range(C)]

    # ---- stage 3a: Conv1d(3->1, kernel=1, no bias): still a scalar (constant over N).
    y0 = uf[0] * p_ref[_W1 + 0] + uf[1] * p_ref[_W1 + 1] + uf[2] * p_ref[_W1 + 2]

    gamma = ln_ref[0].astype(f32)                  # (R, 128)
    beta = ln_ref[1].astype(f32)                   # (R, 128)
    rows, lanes = gamma.shape
    n_pts = rows * lanes
    y = jnp.full((rows, lanes), y0, dtype=f32)     # constant Conv1d(3->1) output row

    # ---- stage 3b: LayerNorm([1, N]) with fused single-pass statistics
    # (sum and sum-of-squares computed together; var = E[y^2] - mean^2).
    inv_n = 1.0 / float(n_pts)
    s1 = jnp.sum(y, axis=1, keepdims=True)               # (R, 1) lane reductions
    s2 = jnp.sum(y * y, axis=1, keepdims=True)            # (R, 1)
    mean = jnp.sum(s1, axis=0, keepdims=True) * inv_n     # (1, 1)
    e_y2 = jnp.sum(s2, axis=0, keepdims=True) * inv_n     # (1, 1)
    var = e_y2 - mean * mean
    y = (y - mean) * lax.rsqrt(var + 1e-5)
    y = y * gamma + beta

    # ---- stage 3c: exact erf GELU (torch default), Conv1d(1->1) affine, Sigmoid.
    y = 0.5 * y * (1.0 + lax.erf(y * (1.0 / math.sqrt(2.0))))
    y = jax.nn.sigmoid(y * p_ref[_C2W] + p_ref[_C2B])

    # The output row is batch-independent: broadcast-store it to all B rows.
    o_ref[...] = jnp.broadcast_to(y[None], o_ref.shape).astype(o_ref.dtype)


def corres_attention_forward(u, x, params):
    """CorresAttention.forward(u, x) -> (B, N)."""
    B, N, c_in = u.shape
    assert c_in == C
    assert params["ln_affine"].shape == (2, N), "LayerNorm([1, 512]) fixes N"
    assert N % LANES == 0
    R = N // LANES
    # `x` (and get_knn_index) never influences the output: softmax over k summed
    # over k is identically 1, so the graph feature collapses to ones; `u` cancels
    # as well (identical keys -> exactly uniform attention).  Both are accepted
    # only for API parity with the PyTorch module.
    del x

    ln = params["ln_affine"].reshape(2, R, LANES)   # lane-dense (8x128-style) tiles

    out = pl.pallas_call(
        _fused_kernel,
        out_shape=jax.ShapeDtypeStruct((B, R, LANES), jnp.float32),
        grid_spec=pltpu.PrefetchScalarGridSpec(
            num_scalar_prefetch=0,
            grid=(1,),                                              # one program total
            in_specs=[
                pl.BlockSpec(memory_space=pltpu.MemorySpace.SMEM),  # packed scalars
                pl.BlockSpec((2, R, LANES), lambda i: (0, 0, 0)),   # LN gamma/beta
            ],
            out_specs=pl.BlockSpec((B, R, LANES), lambda i: (0, 0, 0)),
        ),
        compiler_params=pltpu.CompilerParams(
            dimension_semantics=("arbitrary",),
            # Footprint is a few KB; keep the limit modest so it is valid on v7x
            # (64 MiB physical VMEM) as well as v5e/v6e (128 MiB).
            vmem_limit_bytes=4 * 1024 * 1024,
        ),
        cost_estimate=pl.CostEstimate(
            flops=16 * N,            # LN + GELU + affine elementwise chain
            transcendentals=2 * N,   # erf + sigmoid
            bytes_accessed=_NUM_SCALARS * 4 + 2 * N * 4 + B * N * 4,
        ),
    )(params["packed_scalars"], ln)
    return out.reshape(B, N)


# ----------------------------------------------------------------------------
# Deterministic synthetic parameters, packed for the kernel.
# ----------------------------------------------------------------------------
def init_params(key, N=512):
    k = jax.random.split(key, 8)
    in_proj_w = jax.random.normal(k[0], (3 * C, C), jnp.float32) * 0.3   # MHA in_proj_weight
    in_proj_b = jax.random.normal(k[1], (3 * C,), jnp.float32) * 0.1     # MHA in_proj_bias
    out_w = jax.random.normal(k[2], (C, C), jnp.float32) * 0.3           # MHA out_proj.weight
    out_b = jax.random.normal(k[3], (C,), jnp.float32) * 0.1             # MHA out_proj.bias
    conv1_w = jax.random.normal(k[4], (1, C, 1), jnp.float32) * 0.3      # Conv1d(3,1,1,bias=False)
    ln_gamma = jnp.ones((1, N), jnp.float32)                             # LayerNorm([1,N]).weight
    ln_beta = jax.random.normal(k[7], (1, N), jnp.float32) * 0.1         # LayerNorm([1,N]).bias
    conv2_w = jax.random.normal(k[5], (1, 1, 1), jnp.float32) * 0.5      # Conv1d(1,1,1).weight
    conv2_b = jax.random.normal(k[6], (1,), jnp.float32) * 0.1           # Conv1d(1,1,1).bias

    # W[c_in, c_out] layout (PyTorch linear computes x @ W.T).  Wq/Wk/bq/bk are
    # packed only for parity with the module; the fused kernel never reads them.
    wq = in_proj_w[0 * C:1 * C].T
    wk = in_proj_w[1 * C:2 * C].T
    wv = in_proj_w[2 * C:3 * C].T
    wo = out_w.T
    bq = in_proj_b[0 * C:1 * C]
    bk = in_proj_b[1 * C:2 * C]
    bv = in_proj_b[2 * C:3 * C]
    bo = out_b

    packed = jnp.concatenate([
        wq.reshape(-1), wk.reshape(-1), wv.reshape(-1), wo.reshape(-1),
        bq, bk, bv, bo,
        conv1_w[:, :, 0].reshape(-1),
        conv2_w.reshape(-1), conv2_b.reshape(-1),
    ]).astype(jnp.float32)
    assert packed.shape[0] == _NUM_SCALARS

    ln_affine = jnp.concatenate([ln_gamma, ln_beta], axis=0)             # (2, N)
    return dict(packed_scalars=packed, ln_affine=ln_affine)


if __name__ == "__main__":
    B, N, M = 2, 512, 128   # N = 512 is fixed by LayerNorm([1, 512]) in the module
    key = jax.random.PRNGKey(0)
    ku, kx, kp = jax.random.split(key, 3)
    u = jax.random.normal(ku, (B, N, C), jnp.float32)
    x = jax.random.normal(kx, (B, M, C), jnp.float32)
    params = init_params(kp, N=N)

    out = corres_attention_forward(u, x, params)
    out = jax.block_until_ready(out)
    assert out.shape == (B, N)
    assert bool(jnp.all(jnp.isfinite(out)))
    print("KERNEL_OK")
</pallas_src>

<mosaic_0001>
module attributes {stable_mosaic.version = 11 : i64} {
  func.func @_fused_kernel(%arg0: i32, %arg1: memref<53xf32, #tpu.memory_space<smem>>, %arg2: memref<2x4x128xf32, #tpu.memory_space<vmem>>, %arg3: memref<2x4x128xf32, #tpu.memory_space<vmem>>) attributes {dimension_semantics = [#tpu.dimension_semantics<arbitrary>], iteration_bounds = array<i64: 1>, scalar_prefetch = 0 : i64, scratch_operands = 0 : i64, tpu.core_type = #tpu.core_type<tc>, window_params = [{transform_indices = @transform_0, window_bounds = array<i64: 53>}, {pipeline_mode = #tpu.pipeline_mode<synchronous>, transform_indices = @transform_1, window_bounds = array<i64: 2, 4, 128>}, {pipeline_mode = #tpu.pipeline_mode<synchronous>, transform_indices = @transform_2, window_bounds = array<i64: 2, 4, 128>}]} {
    %c18 = arith.constant 18 : index
    %0 = memref.load %arg1[%c18] : memref<53xf32, #tpu.memory_space<smem>>
    %c21 = arith.constant 21 : index
    %1 = memref.load %arg1[%c21] : memref<53xf32, #tpu.memory_space<smem>>
    %2 = arith.addf %0, %1 : f32
    %c24 = arith.constant 24 : index
    %3 = memref.load %arg1[%c24] : memref<53xf32, #tpu.memory_space<smem>>
    %4 = arith.addf %2, %3 : f32
    %c42 = arith.constant 42 : index
    %5 = memref.load %arg1[%c42] : memref<53xf32, #tpu.memory_space<smem>>
    %6 = arith.addf %4, %5 : f32
    %c19 = arith.constant 19 : index
    %7 = memref.load %arg1[%c19] : memref<53xf32, #tpu.memory_space<smem>>
    %c22 = arith.constant 22 : index
    %8 = memref.load %arg1[%c22] : memref<53xf32, #tpu.memory_space<smem>>
    %9 = arith.addf %7, %8 : f32
    %c25 = arith.constant 25 : index
    %10 = memref.load %arg1[%c25] : memref<53xf32, #tpu.memory_space<smem>>
    %11 = arith.addf %9, %10 : f32
    %c43 = arith.constant 43 : index
    %12 = memref.load %arg1[%c43] : memref<53xf32, #tpu.memory_space<smem>>
    %13 = arith.addf %11, %12 : f32
    %c20 = arith.constant 20 : index
    %14 = memref.load %arg1[%c20] : memref<53xf32, #tpu.memory_space<smem>>
    %c23 = arith.constant 23 : index
    %15 = memref.load %arg1[%c23] : memref<53xf32, #tpu.memory_space<smem>>
    %16 = arith.addf %14, %15 : f32
    %c26 = arith.constant 26 : index
    %17 = memref.load %arg1[%c26] : memref<53xf32, #tpu.memory_space<smem>>
    %18 = arith.addf %16, %17 : f32
    %c44 = arith.constant 44 : index
    %19 = memref.load %arg1[%c44] : memref<53xf32, #tpu.memory_space<smem>>
    %20 = arith.addf %18, %19 : f32
    %c27 = arith.constant 27 : index
    %21 = memref.load %arg1[%c27] : memref<53xf32, #tpu.memory_space<smem>>
    %22 = arith.mulf %6, %21 : f32
    %c30 = arith.constant 30 : index
    %23 = memref.load %arg1[%c30] : memref<53xf32, #tpu.memory_space<smem>>
    %24 = arith.mulf %13, %23 : f32
    %25 = arith.addf %22, %24 : f32
    %c33 = arith.constant 33 : index
    %26 = memref.load %arg1[%c33] : memref<53xf32, #tpu.memory_space<smem>>
    %27 = arith.mulf %20, %26 : f32
    %28 = arith.addf %25, %27 : f32
    %c45 = arith.constant 45 : index
    %29 = memref.load %arg1[%c45] : memref<53xf32, #tpu.memory_space<smem>>
    %30 = arith.addf %28, %29 : f32
    %c28 = arith.constant 28 : index
    %31 = memref.load %arg1[%c28] : memref<53xf32, #tpu.memory_space<smem>>
    %32 = arith.mulf %6, %31 : f32
    %c31 = arith.constant 31 : index
    %33 = memref.load %arg1[%c31] : memref<53xf32, #tpu.memory_space<smem>>
    %34 = arith.mulf %13, %33 : f32
    %35 = arith.addf %32, %34 : f32
    %c34 = arith.constant 34 : index
    %36 = memref.load %arg1[%c34] : memref<53xf32, #tpu.memory_space<smem>>
    %37 = arith.mulf %20, %36 : f32
    %38 = arith.addf %35, %37 : f32
    %c46 = arith.constant 46 : index
    %39 = memref.load %arg1[%c46] : memref<53xf32, #tpu.memory_space<smem>>
    %40 = arith.addf %38, %39 : f32
    %c29 = arith.constant 29 : index
    %41 = memref.load %arg1[%c29] : memref<53xf32, #tpu.memory_space<smem>>
    %42 = arith.mulf %6, %41 : f32
    %c32 = arith.constant 32 : index
    %43 = memref.load %arg1[%c32] : memref<53xf32, #tpu.memory_space<smem>>
    %44 = arith.mulf %13, %43 : f32
    %45 = arith.addf %42, %44 : f32
    %c35 = arith.constant 35 : index
    %46 = memref.load %arg1[%c35] : memref<53xf32, #tpu.memory_space<smem>>
    %47 = arith.mulf %20, %46 : f32
    %48 = arith.addf %45, %47 : f32
    %c47 = arith.constant 47 : index
    %49 = memref.load %arg1[%c47] : memref<53xf32, #tpu.memory_space<smem>>
    %50 = arith.addf %48, %49 : f32
    %c48 = arith.constant 48 : index
    %51 = memref.load %arg1[%c48] : memref<53xf32, #tpu.memory_space<smem>>
    %52 = arith.mulf %30, %51 : f32
    %c49 = arith.constant 49 : index
    %53 = memref.load %arg1[%c49] : memref<53xf32, #tpu.memory_space<smem>>
    %54 = arith.mulf %40, %53 : f32
    %55 = arith.addf %52, %54 : f32
    %c50 = arith.constant 50 : index
    %56 = memref.load %arg1[%c50] : memref<53xf32, #tpu.memory_space<smem>>
    %57 = arith.mulf %50, %56 : f32
    %58 = arith.addf %55, %57 : f32
    %c0 = arith.constant 0 : index
    %c0_0 = arith.constant 0 : index
    %c0_1 = arith.constant 0 : index
    %59 = vector.load %arg2[%c0, %c0_0, %c0_1] : memref<2x4x128xf32, #tpu.memory_space<vmem>>, vector<1x4x128xf32>
    %60 = vector.shape_cast %59 : vector<1x4x128xf32> to vector<4x128xf32>
    %c1 = arith.constant 1 : index
    %c0_2 = arith.constant 0 : index
    %c0_3 = arith.constant 0 : index
    %61 = vector.load %arg2[%c1, %c0_2, %c0_3] : memref<2x4x128xf32, #tpu.memory_space<vmem>>, vector<1x4x128xf32>
    %62 = vector.shape_cast %61 : vector<1x4x128xf32> to vector<4x128xf32>
    %63 = vector.broadcast %58 : f32 to vector<4x128xf32>
    %cst = arith.constant dense<0.000000e+00> : vector<4xf32>
    %64 = vector.multi_reduction <add>, %63, %cst [1] : vector<4x128xf32> to vector<4xf32>
    %65 = vector.shape_cast %64 : vector<4xf32> to vector<4x1xf32>
    %66 = arith.mulf %63, %63 : vector<4x128xf32>
    %cst_4 = arith.constant dense<0.000000e+00> : vector<4xf32>
    %67 = vector.multi_reduction <add>, %66, %cst_4 [1] : vector<4x128xf32> to vector<4xf32>
    %68 = vector.shape_cast %67 : vector<4xf32> to vector<4x1xf32>
    %cst_5 = arith.constant dense<0.000000e+00> : vector<1xf32>
    %69 = vector.multi_reduction <add>, %65, %cst_5 [0] : vector<4x1xf32> to vector<1xf32>
    %70 = vector.shape_cast %69 : vector<1xf32> to vector<1x1xf32>
    %cst_6 = arith.constant 0.001953125 : f32
    %71 = vector.broadcast %cst_6 : f32 to vector<1x1xf32>
    %72 = arith.mulf %70, %71 : vector<1x1xf32>
    %cst_7 = arith.constant dense<0.000000e+00> : vector<1xf32>
    %73 = vector.multi_reduction <add>, %68, %cst_7 [0] : vector<4x1xf32> to vector<1xf32>
    %74 = vector.shape_cast %73 : vector<1xf32> to vector<1x1xf32>
    %cst_8 = arith.constant 0.001953125 : f32
    %75 = vector.broadcast %cst_8 : f32 to vector<1x1xf32>
    %76 = arith.mulf %74, %75 : vector<1x1xf32>
    %77 = arith.mulf %72, %72 : vector<1x1xf32>
    %78 = arith.subf %76, %77 : vector<1x1xf32>
    %79 = vector.broadcast %72 : vector<1x1xf32> to vector<4x128xf32>
    %80 = arith.subf %63, %79 : vector<4x128xf32>
    %cst_9 = arith.constant 9.99999974E-6 : f32
    %81 = vector.broadcast %cst_9 : f32 to vector<1x1xf32>
    %82 = arith.addf %78, %81 : vector<1x1xf32>
    %83 = math.rsqrt %82 : vector<1x1xf32>
    %84 = vector.broadcast %83 : vector<1x1xf32> to vector<4x128xf32>
    %85 = arith.mulf %80, %84 : vector<4x128xf32>
    %86 = arith.mulf %85, %60 : vector<4x128xf32>
    %87 = arith.addf %86, %62 : vector<4x128xf32>
    %cst_10 = arith.constant 5.000000e-01 : f32
    %88 = vector.broadcast %cst_10 : f32 to vector<4x128xf32>
    %89 = arith.mulf %88, %87 : vector<4x128xf32>
    %cst_11 = arith.constant 0.707106769 : f32
    %90 = vector.broadcast %cst_11 : f32 to vector<4x128xf32>
    %91 = arith.mulf %87, %90 : vector<4x128xf32>
    %92 = math.erf %91 : vector<4x128xf32>
    %cst_12 = arith.constant 1.000000e+00 : f32
    %93 = vector.broadcast %cst_12 : f32 to vector<4x128xf32>
    %94 = arith.addf %93, %92 : vector<4x128xf32>
    %95 = arith.mulf %89, %94 : vector<4x128xf32>
    %c51 = arith.constant 51 : index
    %96 = memref.load %arg1[%c51] : memref<53xf32, #tpu.memory_space<smem>>
    %97 = vector.broadcast %96 : f32 to vector<4x128xf32>
    %98 = arith.mulf %95, %97 : vector<4x128xf32>
    %c52 = arith.constant 52 : index
    %99 = memref.load %arg1[%c52] : memref<53xf32, #tpu.memory_space<smem>>
    %100 = vector.broadcast %99 : f32 to vector<4x128xf32>
    %101 = arith.addf %98, %100 : vector<4x128xf32>
    %102 = arith.negf %101 : vector<4x128xf32>
    %103 = math.exp %102 : vector<4x128xf32>
    %cst_13 = arith.constant 1.000000e+00 : f32
    %104 = vector.broadcast %cst_13 : f32 to vector<4x128xf32>
    %105 = arith.addf %104, %103 : vector<4x128xf32>
    %106 = arith.divf %104, %105 : vector<4x128xf32>
    %107 = vector.shape_cast %106 : vector<4x128xf32> to vector<1x4x128xf32>
    %108 = vector.shape_cast %107 : vector<1x4x128xf32> to vector<1x4x128xf32>
    %109 = vector.broadcast %108 : vector<1x4x128xf32> to vector<2x4x128xf32>
    %c0_14 = arith.constant 0 : index
    %c0_15 = arith.constant 0 : index
    %c0_16 = arith.constant 0 : index
    %110 = vector.load %arg3[%c0_14, %c0_15, %c0_16] : memref<2x4x128xf32, #tpu.memory_space<vmem>>, vector<2x4x128xf32>
    tpu.vector_store %arg3[%c0_14, %c0_15, %c0_16], %109 {strides = array<i32>} : memref<2x4x128xf32, #tpu.memory_space<vmem>>, vector<2x4x128xf32>,
    return
  }
  func.func @transform_0(%arg0: i32) -> i32 {
    %c0_i32 = arith.constant 0 : i32
    %c0_i32_0 = arith.constant 0 : i32
    return %c0_i32 : i32
  }
  func.func @transform_1(%arg0: i32) -> (i32, i32, i32) {
    %c0_i32 = arith.constant 0 : i32
    %c0_i32_0 = arith.constant 0 : i32
    %c0_i32_1 = arith.constant 0 : i32
    %c0_i32_2 = arith.constant 0 : i32
    return %c0_i32, %c0_i32_0, %c0_i32_1 : i32, i32, i32
  }
  func.func @transform_2(%arg0: i32) -> (i32, i32, i32) {
    %c0_i32 = arith.constant 0 : i32
    %c0_i32_0 = arith.constant 0 : i32
    %c0_i32_1 = arith.constant 0 : i32
    %c0_i32_2 = arith.constant 0 : i32
    return %c0_i32, %c0_i32_0, %c0_i32_1 : i32, i32, i32
  }
}

</mosaic_0001>

<bundles_post_ra>
// kernel: tpu_custom_call.1
= control target key start
LH: loop header
LB: loop body
LE: loop exit
PB: predicated region body
PF: predicated region fallthrough
CT: control target
= control target key end

     0   :  { %s338_s0 = inlined_call_operand.hbm [shape: f32[53], index: 0, kind: input, shape index: {}]   ;;  %s339_s1 = inlined_call_operand.hbm [shape: f32[2,4,128], index: 1, kind: input, shape index: {}]   ;;  %s340_s2 = inlined_call_operand.hbm [shape: f32[2,4,128], index: 2, kind: output, shape index: {}]  }
   0x1   :  { %344 = sst [smem:[#allocation11_spill]] %s340_s2 }
   0x2   :  { %7 = vsyncpa [#allocation5], 0 }
   0x3   :  { %8 = vsyncpa [#allocation3], 0 }
   0x4   :  { %9 = vsyncpa [#allocation4], 0  ;;  %s210_s11 = scalar_lea.hbm %s338_s0, 16 }
   0x5   :  { %p211_p0 = scmp.ne.s32.totalorder %s338_s0, %s210_s11  ;;  %p214_p1 = scmp.lt.u32.totalorder %s210_s11, %s338_s0 }
   0x7   :  { %p216_p2 = pnand %p214_p1, %p211_p0 }
   0x9   :  { %219 = shalt.err (!%p216_p2)
}
   0xa   :  { %s270_s16 = smov [#allocation2]   ;;  %s271_s19 = smov [#allocation6]  }
   0xb   :  { %17 = dma.hbm_to_smem %s338_s0, 16, %s270_s16, [#allocation5]  }
   0xc   :  { %s23_s20 = sshll.u32 %s271_s19, 4  ;;  %s220_s23 = scalar_lea.hbm %s339_s1, 128  ;;  %s24_s20 = int_to_ptr.vmem [resolvable:$true] %s23_s20 }
   0xd   :  { %p221_p3 = scmp.ne.s32.totalorder %s339_s1, %s220_s23  ;;  %p224_p4 = scmp.lt.u32.totalorder %s220_s23, %s339_s1 }
   0xf   :  { %p226_p5 = pnand %p224_p4, %p221_p3 }
  0x11   :  { %229 = shalt.err (!%p226_p5)
}
  0x12   :  { %s230_s28 = scalar_lea.vmem %s24_s20, 128  ;;  %p235_p7 = scmp.lt.s32.totalorder %s24_s20, %s24_s20 }
  0x13   :  { %p231_p6 = scmp.ne.s32.totalorder %s24_s20, %s230_s28  ;;  %p236_p8 = scmp.lt.s32.totalorder %s230_s28, %s230_s28 }
  0x15   :  { %p237_p9 = por %p236_p8, %p235_p7 }
  0x17   :  { %p238_p10 = pnand %p237_p9, %p231_p6 }
  0x19   :  { %241 = shalt.err (!%p238_p10)
}
  0x1a   :  { %s341_s0 = smov 64   ;;  %s342_s29 = smov 4  }
  0x1b   :  { %29 = dma.hbm_to_vmem [thread:$0]  %s339_s1, 128, %s24_s20, [#allocation3], %s341_s0, %s341_s0, %s342_s29  }
  0x1c   :  { %264 = dma.done.wait [#allocation5], 16  }
  0x1d   :  { %265 = vsyncadd [#allocation5], 4294967280 }
  0x1e   :  { %266 = dma.done.wait [#allocation3], 128  }
  0x1f   :  { %267 = vsyncadd [#allocation3], 4294967168 }
  0x20   :  { %36 = sfence }
  0x21   :  { %s167_s4 = sld [smem:[#allocation2 + $0x12]]  ;;  %s168_s5 = sld [smem:[#allocation2 + $0x15]]  ;;  %vm105_vm0 = vcmask 1043456   ;;  %v96_v25 = vld [vmem:[#allocation6] sm:$0xf] }
  0x22   :  { %s169_s6 = sld [smem:[#allocation2 + $0x18]]  ;;  %s170_s7 = sld [smem:[#allocation2 + $0x2a]]  ;;  %v98_v27 = vld [vmem:[#allocation6 + $0x4] sm:$0xf] }
  0x23   :  { %s171_s8 = sld [smem:[#allocation2 + $0x13]]  ;;  %s172_s9 = sld [smem:[#allocation2 + $0x16]] }
  0x24   :  { %s173_s10 = sld [smem:[#allocation2 + $0x19]]  ;;  %s174_s11 = sld [smem:[#allocation2 + $0x2b]] }
  0x25   :  { %s175_s12 = sld [smem:[#allocation2 + $0x14]]  ;;  %s176_s13 = sld [smem:[#allocation2 + $0x17]] }
  0x26   :  { %s177_s14 = sld [smem:[#allocation2 + $0x1a]]  ;;  %s178_s15 = sld [smem:[#allocation2 + $0x2c]] }
  0x27   :  { %s39_s16 = sadd.f32 %s168_s5, %s167_s4  ;;  %s179_s17 = sld [smem:[#allocation2 + $0x1b]] }
  0x28   :  { %s180_s1 = sld [smem:[#allocation2 + $0x1e]]  ;;  %s181_s18 = sld [smem:[#allocation2 + $0x21]] }
  0x29   :  { %s41_s19 = sadd.f32 %s169_s6, %s39_s16  ;;  %s317_s20 = sld [smem:[#allocation2 + $0x2d]] }
  0x2a   :  { %s46_s21 = sadd.f32 %s172_s9, %s171_s8  ;;  %s183_s22 = sld [smem:[#allocation2 + $0x1c]] }
  0x2b   :  { %s43_s23 = sadd.f32 %s170_s7, %s41_s19  ;;  %s184_s24 = sld [smem:[#allocation2 + $0x1f]] }
  0x2c   :  { %s48_s25 = sadd.f32 %s173_s10, %s46_s21  ;;  %s185_s26 = sld [smem:[#allocation2 + $0x22]] }
  0x2d   :  { %s53_s27 = sadd.f32 %s176_s13, %s175_s12  ;;  %s59_s28 = smul.f32 %s179_s17, %s43_s23 }
  0x2e   :  { %s50_s30 = sadd.f32 %s174_s11, %s48_s25  ;;  %s319_s3 = sld [smem:[#allocation2 + $0x2e]] }
  0x2f   :  { %s55_s0 = sadd.f32 %s177_s14, %s53_s27  ;;  %s187_s29 = sld [smem:[#allocation2 + $0x1d]] }
  0x30   :  { %s61_s4 = smul.f32 %s180_s1, %s50_s30  ;;  %s188_s5 = sld [smem:[#allocation2 + $0x20]] }
  0x31   :  { %s57_s2 = sadd.f32 %s178_s15, %s55_s0  ;;  %s69_s6 = smul.f32 %s183_s22, %s43_s23 }
  0x32   :  { %s62_s16 = sadd.f32 %s61_s4, %s59_s28  ;;  %s71_s8 = smul.f32 %s184_s24, %s50_s30 }
  0x33   :  { %s64_s9 = smul.f32 %s181_s18, %s57_s2  ;;  %s189_s7 = sld [smem:[#allocation2 + $0x23]] }
  0x34   :  { %s72_s19 = sadd.f32 %s71_s8, %s69_s6  ;;  %s74_s10 = smul.f32 %s185_s26, %s57_s2 }
  0x35   :  { %s65_s21 = sadd.f32 %s64_s9, %s62_s16  ;;  %s79_s12 = smul.f32 %s187_s29, %s43_s23 }
  0x36   :  { %s81_s13 = smul.f32 %s188_s5, %s50_s30  ;;  %s75_s11 = sadd.f32 %s74_s10, %s72_s19 }
  0x37   :  { %s190_s17 = sld [smem:[#allocation2 + $0x2f]]  ;;  %s67_s25 = sadd.f32 %s317_s20, %s65_s21 }
  0x38   :  { %s191_s14 = sld [smem:[#allocation2 + $0x30]]  ;;  %s82_s27 = sadd.f32 %s81_s13, %s79_s12 }
  0x39   :  { %s84_s1 = smul.f32 %s189_s7, %s57_s2  ;;  %s192_s0 = sld [smem:[#allocation2 + $0x31]] }
  0x3a   :  { %s193_s15 = sld [smem:[#allocation2 + $0x32]]  ;;  %s77_s4 = sadd.f32 %s319_s3, %s75_s11 }
  0x3b   :  { %s85_s22 = sadd.f32 %s84_s1, %s82_s27  ;;  %s194_s2 = sld [smem:[#allocation2 + $0x33]] }
  0x3c   :  { %s195_s29 = sld [smem:[#allocation2 + $0x34]]  ;;  %s274_s20 = smov [#allocation7]  }
  0x3d   :  { %s87_s28 = sadd.f32 %s190_s17, %s85_s22  ;;  %s154_s23 = sshll.u32 %s274_s20, 4  ;;  %s155_s23 = int_to_ptr.vmem [resolvable:$true] %s154_s23 }
  0x3e   :  { %s89_s24 = smul.f32 %s191_s14, %s67_s25  ;;  %s242_s30 = scalar_lea.vmem %s155_s23, 128 }
  0x3f   :  { %s91_s18 = smul.f32 %s192_s0, %s77_s4  ;;  %p243_p11 = scmp.ne.s32.totalorder %s155_s23, %s242_s30 }
  0x40   :  { %s94_s6 = smul.f32 %s193_s15, %s87_s28  ;;  %p247_p12 = scmp.lt.s32.totalorder %s155_s23, %s155_s23 }
  0x41   :  { %s92_s8 = sadd.f32 %s91_s18, %s89_s24  ;;  %v136_v34 = vstv %s194_s2  ;;  %p248_p13 = scmp.lt.s32.totalorder %s242_s30, %s242_s30 }
  0x42   :  { %v139_v36 = vstv %s195_s29 }
  0x43   :  { %s95_s26 = sadd.f32 %s94_s6, %s92_s8  ;;  %p249_p0 = por %p248_p13, %p247_p12 }
  0x45   :  { %v99_v0 = vstv %s95_s26  ;;  %p250_p1 = pnand %p249_p0, %p243_p11 }
  0x46   :  { %100 = vadd.xlane.f32.xlu0 %v99_v0  ;;  %v102_v1 = vmul.f32 %v99_v0, %v99_v0 }
  0x4a   :  { %103 = vadd.xlane.f32.xlu0 %v102_v1 }
  0xd3   :  { %v101_v2 = vpop.xlane.xlu0 %100 }
  0xd4   :  { %v106_v3 = vsel %vm105_vm0, %v101_v2, 0.0 }
  0xd5   :  { %v107_v4 = vrot.slane %v106_v3, 4 }
  0xd7   :  { %v108_v5 = vadd.f32 %v107_v4, %v106_v3  ;;  %v104_v6 = vpop.xlane.xlu0 %103 }
  0xd8   :  { %v114_v7 = vsel %vm105_vm0, %v104_v6, 0.0 }
  0xd9   :  { %v109_v8 = vrot.slane %v108_v5, 2  ;;  %v115_v9 = vrot.slane %v114_v7, 4 }
  0xdb   :  { %v110_v10 = vadd.f32 %v109_v8, %v108_v5  ;;  %v116_v11 = vadd.f32 %v115_v9, %v114_v7 }
  0xdd   :  { %v111_v12 = vrot.slane %v110_v10, 1  ;;  %v117_v13 = vrot.slane %v116_v11, 2 }
  0xdf   :  { %v112_v14 = vadd.f32 %v111_v12, %v110_v10  ;;  %v118_v15 = vadd.f32 %v117_v13, %v116_v11 }
  0xe1   :  { %v113_v16 = vmul.f32 0.001953125, %v112_v14  ;;  %v119_v17 = vrot.slane %v118_v15, 1 }
  0xe3   :  { %v120_v18 = vadd.f32 %v119_v17, %v118_v15  ;;  %v122_v19 = vmul.f32 %v113_v16, %v113_v16  ;;  %v124_v23 = vsub.f32 %v99_v0, %v113_v16 }
  0xe5   :  { %v121_v20 = vmul.f32 0.001953125, %v120_v18 }
  0xe7   :  { %v123_v21 = vsub.f32 %v121_v20, %v122_v19 }
  0xe9   :  { %v125_v22 = vadd.f32 1e-05, %v123_v21 }
  0xeb   :  { %202 = vrsqrt.f32 %v125_v22 }
  0xf5   :  { %v203_v24 = vpop.eup %202 }
  0xf6   :  { %v127_v26 = vmul.f32 %v203_v24, %v124_v23 }
  0xf8   :  { %v128_v28 = vmul.f32 %v127_v26, %v96_v25 }
  0xfa   :  { %v129_v29 = vadd.f32 %v128_v28, %v98_v27 }
  0xfc   :  { %v131_v30 = vmul.f32 0.70710677, %v129_v29  ;;  %v130_v32 = vmul.f32 0.5, %v129_v29 }
  0xfe   :  { %204 = verf.f32 %v131_v30 }
 0x108   :  { %v205_v31 = vpop.eup %204 }
 0x109   :  { %v133_v33 = vadd.f32 1.0, %v205_v31 }
 0x10b   :  { %v134_v35 = vmul.f32 %v133_v33, %v130_v32 }
 0x10d   :  { %v137_v37 = vmul.f32 %v136_v34, %v134_v35 }
 0x10f   :  { %v140_v38 = vadd.f32 %v139_v36, %v137_v37 }
 0x111   :  { %v196_v39 = vmul.f32 -1.442695, %v140_v38 }
 0x113   :  { %206 = vpow2.f32 %v196_v39 }
 0x11d   :  { %v207_v40 = vpop.eup %206 }
 0x11e   :  { %v144_v41 = vadd.f32 1.0, %v207_v40 }
 0x120   :  { %208 = vrcp.f32 %v144_v41 }
 0x12a   :  { %v209_v42 = vpop.eup %208 }
 0x12b   :  { %147 = vst [vmem:[#allocation7] sm:$0xf] %v209_v42  ;;  %148 = vst [vmem:[#allocation7 + $0x4] sm:$0xf] %v209_v42 }
 0x12c   :  { %253 = shalt.err (!%p250_p1)
}
 0x12d   :  { %s345_s16 = sld [smem:[#allocation11_spill]] }
 0x133   :  { %s254_s9 = scalar_lea.hbm %s345_s16, 128 }
 0x134   :  { %p255_p2 = scmp.ne.s32.totalorder %s345_s16, %s254_s9  ;;  %p258_p3 = scmp.lt.u32.totalorder %s254_s9, %s345_s16 }
 0x136   :  { %p260_p4 = pnand %p258_p3, %p255_p2 }
 0x138   :  { %263 = shalt.err (!%p260_p4)
}
 0x139   :  { %s346_s12 = smov 4   ;;  %s347_s13 = smov 64  }
 0x13a   :  { %160 = dma.vmem_to_hbm [thread:$0]  %s155_s23, 128, %s345_s16, [#allocation4], %s347_s13, %s347_s13, %s346_s12  }
 0x13b   :  { %268 = dma.done.wait [#allocation4], 128  }
 0x13c   :  { %269 = vsyncadd [#allocation4], 4294967168 }
 0x13d   :  { %164 = vsyncpa [#allocation3], 1 }
 0x13e   :  { %165 = vsyncpa [#allocation4], 1 }
 0x13f   :  { %166 = vsyncpa [#allocation5], 1 }

</bundles_post_ra>
